<compile_context>
chip_gen: v6e
topology: v6e:2x2x1
jax: 0.10.0
libtpu: 0.0.40
codegen_flags: <defaults>
</compile_context>

<pallas_src>
import jax
import jax.numpy as jnp
from jax.experimental import pallas as pl
from jax.experimental.pallas import tpu as pltpu

BN_EPS = 1e-5          # nn.BatchNorm2d default
LEAKY_SLOPE = 0.01     # F.leaky_relu default negative_slope


def _conv_bn_act_kernel(x_ref, w_ref, b_ref, o_ref):
    # x_ref: (Cin, T)    bf16   pixels-on-lanes tile of one batch element
    # w_ref: (Cout, Cin) bf16   BN-folded 1x1 conv weight
    # b_ref: (Cout, 1)   f32    BN-folded bias
    # o_ref: (Cout, T)   f32
    y = jnp.dot(w_ref[...], x_ref[...], preferred_element_type=jnp.float32)  # MXU
    y = y + b_ref[...]
    o_ref[...] = jnp.maximum(y, LEAKY_SLOPE * y).astype(o_ref.dtype)


def _pick_hw_tile(hw, cap=1024):
    """Largest multiple of 128 that divides hw (capped); else the full extent."""
    if hw % 128 == 0:
        t = 128
        while t * 2 <= cap and hw % (t * 2) == 0:
            t *= 2
        return t
    return hw


def conv_bn_act_1x1(x_nchw, w_oi, gamma, beta, mean, var, *, hw_tile_cap=1024):
    """One ConvBNLayer (kernel_size=1, eval-mode BN) forward.

    x_nchw: (N, Cin, H, W);  w_oi: (Cout, Cin);  gamma/beta/mean/var: (Cout,)
    Returns (N, Cout, H, W) float32.
    """
    N, Cin, H, W = x_nchw.shape
    Cout = w_oi.shape[0]
    HW = H * W

    # --- Fold BN (inference) into the conv weight + bias, once, on the host. ---
    scale = gamma.astype(jnp.float32) * jax.lax.rsqrt(var.astype(jnp.float32) + BN_EPS)
    w_f = (w_oi.astype(jnp.float32) * scale[:, None]).astype(jnp.bfloat16)   # (Cout, Cin)
    b_f = (beta.astype(jnp.float32) - mean.astype(jnp.float32) * scale)
    b_f = b_f.reshape(Cout, 1)                                               # (Cout, 1) f32

    # Free reshape (no transpose): channels stay on the sublane axis,
    # pixels on the lane axis.  bf16 halves the kernel's HBM read bytes
    # (in a real graph this convert fuses into the producer op).
    x3 = x_nchw.reshape(N, Cin, HW).astype(jnp.bfloat16)                     # (N, Cin, HW)

    T = _pick_hw_tile(HW, hw_tile_cap)
    grid = (N, HW // T)

    out = pl.pallas_call(
        _conv_bn_act_kernel,
        out_shape=jax.ShapeDtypeStruct((N, Cout, HW), jnp.float32),
        grid=grid,
        in_specs=[
            # x tile: one batch element (squeezed), full channels, T pixels.
            pl.BlockSpec((pl.Squeezed(), Cin, T), lambda n, t: (n, 0, t)),
            # Folded weight / bias: whole array, constant across the grid.
            pl.BlockSpec((Cout, Cin), lambda n, t: (0, 0)),
            pl.BlockSpec((Cout, 1), lambda n, t: (0, 0)),
        ],
        out_specs=pl.BlockSpec((pl.Squeezed(), Cout, T), lambda n, t: (n, 0, t)),
        compiler_params=pltpu.CompilerParams(
            dimension_semantics=("parallel", "parallel")),
    )(x3, w_f, b_f)

    return out.reshape(N, Cout, H, W)


def channel_t_forward(xs, params):
    """Channel_T.forward: independent ConvBNLayer per scale. xs: list of NCHW arrays."""
    return [
        conv_bn_act_1x1(x, p["w"], p["gamma"], p["beta"], p["mean"], p["var"])
        for x, p in zip(xs, params)
    ]


def _reference(xs, params):
    """Pure-JAX f32 reference (matches PyTorch conv1x1 -> BN(eval) -> leaky_relu)."""
    outs = []
    for x, p in zip(xs, params):
        y = jnp.einsum("nchw,oc->nohw", x, p["w"])
        inv_std = 1.0 / jnp.sqrt(p["var"] + BN_EPS)
        y = (y - p["mean"][None, :, None, None]) * (inv_std * p["gamma"])[None, :, None, None] \
            + p["beta"][None, :, None, None]
        outs.append(jnp.where(y >= 0, y, LEAKY_SLOPE * y))
    return outs


def make_params(key, in_channels, out_channels):
    params = []
    for i, cin in enumerate(in_channels):
        k = jax.random.fold_in(key, i)
        kw, kg, kb, km, kv = jax.random.split(k, 5)
        params.append(dict(
            w=jax.random.normal(kw, (out_channels, cin), jnp.float32) * 0.05,
            gamma=1.0 + 0.1 * jax.random.normal(kg, (out_channels,), jnp.float32),
            beta=0.1 * jax.random.normal(kb, (out_channels,), jnp.float32),
            mean=0.1 * jax.random.normal(km, (out_channels,), jnp.float32),
            var=jnp.abs(jax.random.normal(kv, (out_channels,), jnp.float32)) + 0.5,
        ))
    return params


if __name__ == "__main__":
    key = jax.random.PRNGKey(0)

    # Small shapes consistent with the module: 3 pyramid levels, NCHW inputs.
    in_channels = (16, 32, 64)
    out_channels = 32
    batch = 2
    spatial = (16, 8, 4)   # typical FPN: finer -> coarser

    kx, kp = jax.random.split(key)
    xs = []
    for i, (cin, s) in enumerate(zip(in_channels, spatial)):
        xs.append(jax.random.normal(jax.random.fold_in(kx, i), (batch, cin, s, s), jnp.float32))

    params = make_params(kp, in_channels, out_channels)

    outs = channel_t_forward(xs, params)
    outs = [jax.block_until_ready(o) for o in outs]

    refs = _reference(xs, params)
    for o, r in zip(outs, refs):
        assert o.shape == r.shape, (o.shape, r.shape)
        # bf16 inputs/weights inside the kernel -> looser tolerance vs the f32 reference.
        assert jnp.allclose(o, r, atol=5e-2, rtol=5e-2), float(jnp.max(jnp.abs(o - r)))

    print("KERNEL_OK")
</pallas_src>

<mosaic_0001>
module attributes {stable_mosaic.version = 11 : i64} {
  func.func @_conv_bn_act_kernel(%arg0: i32, %arg1: i32, %arg2: memref<1x16x256xbf16, #tpu.memory_space<vmem>>, %arg3: memref<32x16xbf16, #tpu.memory_space<vmem>>, %arg4: memref<32x1xf32, #tpu.memory_space<vmem>>, %arg5: memref<1x32x256xf32, #tpu.memory_space<vmem>>) attributes {dimension_semantics = [#tpu.dimension_semantics<parallel>, #tpu.dimension_semantics<parallel>], iteration_bounds = array<i64: 2, 1>, scalar_prefetch = 0 : i64, scratch_operands = 0 : i64, tpu.core_type = #tpu.core_type<tc>, window_params = [{transform_indices = @transform_0, window_bounds = array<i64: 1, 16, 256>}, {pipeline_mode = #tpu.pipeline_mode<synchronous>, transform_indices = @transform_1, window_bounds = array<i64: 32, 16>}, {pipeline_mode = #tpu.pipeline_mode<synchronous>, transform_indices = @transform_2, window_bounds = array<i64: 32, 1>}, {transform_indices = @transform_3, window_bounds = array<i64: 1, 32, 256>}]} {
    %c0 = arith.constant 0 : index
    %c0_0 = arith.constant 0 : index
    %0 = vector.load %arg3[%c0, %c0_0] : memref<32x16xbf16, #tpu.memory_space<vmem>>, vector<32x16xbf16>
    %c0_1 = arith.constant 0 : index
    %c0_2 = arith.constant 0 : index
    %c0_3 = arith.constant 0 : index
    %1 = vector.load %arg2[%c0_1, %c0_2, %c0_3] : memref<1x16x256xbf16, #tpu.memory_space<vmem>>, vector<1x16x256xbf16>
    %2 = vector.shape_cast %1 : vector<1x16x256xbf16> to vector<16x256xbf16>
    %cst = arith.constant dense<0.000000e+00> : vector<32x256xf32>
    %3 = tpu.matmul %0, %2, %cst {dimension_numbers = #tpu.dot_dimension_numbers<[1], [0], [0], [1], [0, 0, 1, 1], [], []>} : vector<32x16xbf16>, vector<16x256xbf16>, vector<32x256xf32> -> vector<32x256xf32>
    %c0_4 = arith.constant 0 : index
    %c0_5 = arith.constant 0 : index
    %4 = vector.load %arg4[%c0_4, %c0_5] : memref<32x1xf32, #tpu.memory_space<vmem>>, vector<32x1xf32>
    %5 = vector.broadcast %4 : vector<32x1xf32> to vector<32x256xf32>
    %6 = arith.addf %3, %5 : vector<32x256xf32>
    %cst_6 = arith.constant 0.00999999977 : f32
    %7 = vector.broadcast %cst_6 : f32 to vector<32x256xf32>
    %8 = arith.mulf %7, %6 : vector<32x256xf32>
    %9 = arith.maximumf %6, %8 : vector<32x256xf32>
    %c0_7 = arith.constant 0 : index
    %c0_8 = arith.constant 0 : index
    %c0_9 = arith.constant 0 : index
    %10 = vector.load %arg5[%c0_7, %c0_8, %c0_9] : memref<1x32x256xf32, #tpu.memory_space<vmem>>, vector<1x32x256xf32>
    %11 = vector.shape_cast %10 : vector<1x32x256xf32> to vector<32x256xf32>
    %12 = vector.shape_cast %9 : vector<32x256xf32> to vector<1x32x256xf32>
    tpu.vector_store %arg5[%c0_7, %c0_8, %c0_9], %12 {strides = array<i32>} : memref<1x32x256xf32, #tpu.memory_space<vmem>>, vector<1x32x256xf32>,
    return
  }
  func.func @transform_0(%arg0: i32, %arg1: i32) -> (i32, i32, i32) {
    %c0_i32 = arith.constant 0 : i32
    %c0_i32_0 = arith.constant 0 : i32
    return %arg0, %c0_i32, %arg1 : i32, i32, i32
  }
  func.func @transform_1(%arg0: i32, %arg1: i32) -> (i32, i32) {
    %c0_i32 = arith.constant 0 : i32
    %c0_i32_0 = arith.constant 0 : i32
    %c0_i32_1 = arith.constant 0 : i32
    return %c0_i32, %c0_i32_0 : i32, i32
  }
  func.func @transform_2(%arg0: i32, %arg1: i32) -> (i32, i32) {
    %c0_i32 = arith.constant 0 : i32
    %c0_i32_0 = arith.constant 0 : i32
    %c0_i32_1 = arith.constant 0 : i32
    return %c0_i32, %c0_i32_0 : i32, i32
  }
  func.func @transform_3(%arg0: i32, %arg1: i32) -> (i32, i32, i32) {
    %c0_i32 = arith.constant 0 : i32
    %c0_i32_0 = arith.constant 0 : i32
    return %arg0, %c0_i32, %arg1 : i32, i32, i32
  }
}

</mosaic_0001>

<bundles_post_ra>
// kernel: tpu_custom_call.1
= control target key start
LH: loop header
LB: loop body
LE: loop exit
PB: predicated region body
PF: predicated region fallthrough
CT: control target
= control target key end

     0   :  { %8 = vsyncpa [#allocation3], 0  ;;  %s756_s0 = inlined_call_operand.vmem [shape: bf16[2,16,256], index: 0, kind: input, shape index: {}]   ;;  %s757_s1 = inlined_call_operand.vmem [shape: bf16[32,16], index: 1, kind: input, shape index: {}]   ;;  %s758_s2 = inlined_call_operand.vmem [shape: f32[32,1], index: 2, kind: input, shape index: {}]   ;;  %s759_s3 = inlined_call_operand.hbm [shape: f32[2,32,256], index: 3, kind: output, shape index: {}]  }
   0x1   :  { %10 = vsyncpa [#allocation3 + $0x1], 0  ;;  %s620_s12 = smov 0   ;;  %s622_s13 = smov 0  }
   0x2   :  { %s624_s14 = smov 0   ;;  %s626_s15 = smov 0  }
   0x3   :  { %s628_s16 = smov 0   ;;  %s630_s17 = smov 0  }
   0x4 LB: > { %s430_s18 = sadd.s32 4294967295, %s594_s17   ;;  %s431_s19 = sadd.s32 4294967294, %s594_s17   ;;  %s594_s17 = sphi %s630_s17, %s16_s17   ;;  %s590_s16 = sphi %s628_s16, %s766_s16   ;;  %s586_s15 = sphi %s626_s15, %s765_s15   ;;  %s582_s14 = sphi %s624_s14, %s764_s14   ;;  %s578_s13 = sphi %s622_s13, %s763_s13   ;;  %s574_s12 = sphi %s620_s12, %s762_s12  }
   0x5   : > { %s28_s20 = sadd.s32 1, %s590_s16  ;;  %s107_s21 = sadd.s32 1, %s582_s14 }
   0x6   : > { %p30_p0 = scmp.ge.s32.totalorder %s28_s20, 2  ;;  %p117_p1 = scmp.ne.s32.totalorder %s582_s14, %s578_s13 }
   0x7   : > { %p118_p2 = scmp.eq.s32.totalorder %s430_s18, 1  ;;  %p123_p3 = scmp.ne.s32.totalorder %s578_s13, %s574_s12 }
   0x8   : > { %s768_s20 = smov (%p30_p0, %s28_s20), 0  ;;  %p124_p5 = scmp.eq.s32.totalorder %s431_s19, 1 }
   0x9   : > { %p660_p4 = por %p118_p2, %p117_p1  ;;  %s102_s23 = ssub.s32 %s590_s16, %s768_s20 }
   0xa   : > { %p434_p6 = scmp.ge.s32.totalorder %s594_s17, 1  ;;  %p105_p7 = scmp.eq.s32.totalorder %s102_s23, 0 }
   0xb   : > { %p667_p8 = por %p124_p5, %p123_p3  ;;  %p161_p9 = scmp.lt.s32.totalorder %s594_s17, 3 }
   0xc   : > { %s673_s25 = scalar_select %p105_p7, %s582_s14, %s107_s21  }
   0xd   : > { %p162_p10 = pnand %p434_p6, %p161_p9 }
   0xe   : > { %p190_p11 = scmp.lt.s32.totalorder (!%p162_p10), %s586_s15, 1  ;;  %s450_s29 = sshll.u32 (!%p162_p10), %s586_s15, 10 }
   0xf   : > { %165 = sbr.rel (%p162_p10) target bundleno = 249 (0xf9), region = 32  ;;  %s705_s6 = scalar_lea.hbm (!%p162_p10), %s759_s3, %s450_s29 }
  0x10   : > { %s597_s8 = smov (!%p162_p10), [#allocation2]  }
  0x11   : > { %s522_s9 = sshll.u32 (!%p162_p10), %s597_s8, 4  ;;  %s523_s9 = int_to_ptr.vmem [resolvable:$false] %s522_s9 }
  0x12   : > { %s524_s10 = scalar_lea.vmem (!%p162_p10), %s523_s9, 2048 }
  0x14   : > { %v596_v0 = vmov 0   ;;  %s191_s26 = scalar_select %p190_p11, %s586_s15, 1  ;;  %v209_v1 = vld [vmem:[%s758_s2 + $0x10] sm:$0xff]  ;;  %v207_v2 = vld [vmem:[%s758_s2] sm:$0xff]  ;;  %v210_v3 = vld [vmem:[%s758_s2 + $0x18] sm:$0xff]  ;;  %vm251_vm0 = vcmask 130048  }
  0x15   : > { %290 = vmatprep.mubr.bf16.mxu0 %v596_v0  ;;  %300 = vmatprep.mubr.bf16.mxu1 %v596_v0  ;;  %v208_v4 = vld [vmem:[%s758_s2 + $0x8] sm:$0xff]  ;;  %v516_v7 = vld [vmem:[%s757_s1] sm:$0xff]  }
  0x16   : > { %512 = vset.pattern.permute.xlu1 %v596_v0  ;;  %511 = vset.pattern.permute.xlu0 %v596_v0  ;;  %s449_s4 = sshll.u32 %s191_s26, 4  ;;  %v517_v8 = vld [vmem:[%s757_s1 + $0x8] sm:$0xff]   ;;  %s186_s26 = sand.u32 1, %s578_s13  }
  0x17   : > { %223 = vperm.xlu1 %512, %v209_v1   ;;  %213 = vperm.xlu0 %511, %v207_v2   ;;  %s197_s11 = scalar_lea.vmem %s756_s0, %s449_s4  ;;  %s435_s27 = sshll.u32 %s186_s26, 6 }
  0x18   : > { %v513_v5 = vld [vmem:[%s197_s11 + $0x4] ss:$8 sps:$4 sm:$0xff]   ;;  %v515_v6 = vld [vmem:[%s197_s11] ss:$8 sps:$4 sm:$0xff]   ;;  %s188_s28 = scalar_lea.vmem [#allocation2], %s435_s27  ;;  %s711_s15 = scalar_lea.sflag [#allocation3], %s186_s26 }
  0x19   : > { %272 = vmatprep.subr.bf16.mxu0 %v513_v5  ;;  %451 = vmatprep.subr.bf16.mxu1 %v513_v5  ;;  %s351_s30 = sshll.u32 %s188_s28, 4  ;;  %s707_s30 = int_to_ptr.vmem [resolvable:$true] %s351_s30 }
  0x1a   : > { %273 = vmatpush1.bf16.msra.mxu0 %v515_v6  ;;  %452 = vmatpush1.bf16.msra.mxu1 %v515_v6  ;;  %s518_s7 = scalar_lea.vmem %s707_s30, 1024  ;;  %p525_p1 = scmp.lt.s32.totalorder %s707_s30, %s523_s9 }
  0x1b   : > { %228 = vperm.xlu1 %512, %v210_v3   ;;  %218 = vperm.xlu0 %511, %v208_v4   ;;  %p519_p12 = scmp.ne.s32.totalorder %s707_s30, %s518_s7  ;;  %p526_p2 = scmp.lt.s32.totalorder %s524_s10, %s518_s7 }
  0x1d   : > { %442 = vmatmul.mubr.msk.bf16.vlgmr.msra.gmra.mxu0 %vm251_vm0, %v516_v7  ;;  %443 = vmatmul.mubr.msk.bf16.vlgmr.msra.gmra.mxu1 %vm251_vm0, %v517_v8  ;;  %p520_p13 = pnand %p519_p12, %p660_p4  ;;  %p527_p3 = por %p526_p2, %p525_p1 }
  0x1f   : > { %p521_p0 = pneg %p520_p13 }
  0x21   : > { %p528_p5 = pnand %p527_p3, %p521_p0 }
  0x92   : > { %v224_v9 = vpop.permute.xlu1 %223  ;;  %v214_v10 = vpop.permute.xlu0 %213 }
  0x96   : > { %v229_v25 = vpop.permute.xlu1 %228  ;;  %v219_v26 = vpop.permute.xlu0 %218 }
  0xdd   : > { %v292_v11 = vpop.f32.mrf.mxu0  ;;  %v302_v12 = vpop.f32.mrf.mxu1 }
  0xde   : > { %v293_v13 = vadd.f32 %v292_v11, %v214_v10  ;;  %v303_v14 = vadd.f32 %v302_v12, %v224_v9 }
  0xdf   : > { %v294_v15 = vpop.f32.mrf.mxu0  ;;  %v304_v16 = vpop.f32.mrf.mxu1 }
  0xe0   : > { %v311_v17 = vmul.f32 0.01, %v293_v13  ;;  %v315_v18 = vmul.f32 0.01, %v303_v14  ;;  %v295_v19 = vadd.f32 %v294_v15, %v214_v10  ;;  %v305_v20 = vadd.f32 %v304_v16, %v224_v9 }
  0xe1   : > { %v296_v21 = vpop.f32.mrf.mxu0  ;;  %v306_v22 = vpop.f32.mrf.mxu1 }
  0xe2   : > { %v319_v23 = vmax.f32 %v293_v13, %v311_v17  ;;  %v323_v24 = vmax.f32 %v303_v14, %v315_v18  ;;  %v312_v27 = vmul.f32 0.01, %v295_v19  ;;  %v316_v28 = vmul.f32 0.01, %v305_v20 }
  0xe3   : > { %v297_v29 = vadd.f32 %v296_v21, %v219_v26  ;;  %v307_v30 = vadd.f32 %v306_v22, %v229_v25  ;;  %v298_v31 = vpop.f32.mrf.mxu0  ;;  %v308_v32 = vpop.f32.mrf.mxu1 }
  0xe4   : > { %327 = vst [vmem:[%s188_s28] sm:$0xff] %v319_v23  ;;  %331 = vst [vmem:[%s188_s28 + $0x20] sm:$0xff] %v323_v24  ;;  %v320_v33 = vmax.f32 %v295_v19, %v312_v27  ;;  %v324_v34 = vmax.f32 %v305_v20, %v316_v28  ;;  %v299_v35 = vadd.f32 %v298_v31, %v219_v26 }
  0xe5   : > { %v309_v36 = vadd.f32 %v308_v32, %v229_v25  ;;  %v313_v37 = vmul.f32 0.01, %v297_v29  ;;  %v317_v38 = vmul.f32 0.01, %v307_v30 }
  0xe6   : > { %328 = vst [vmem:[%s188_s28 + $0x8] sm:$0xff] %v320_v33  ;;  %332 = vst [vmem:[%s188_s28 + $0x28] sm:$0xff] %v324_v34  ;;  %v314_v39 = vmul.f32 0.01, %v299_v35 }
  0xe7   : > { %v318_v40 = vmul.f32 0.01, %v309_v36  ;;  %v321_v41 = vmax.f32 %v297_v29, %v313_v37  ;;  %v325_v42 = vmax.f32 %v307_v30, %v317_v38 }
  0xe8   : > { %v322_v43 = vmax.f32 %v299_v35, %v314_v39 }
  0xe9   : > { %v326_v44 = vmax.f32 %v309_v36, %v318_v40  ;;  %329 = vst [vmem:[%s188_s28 + $0x10] sm:$0xff] %v321_v41  ;;  %333 = vst [vmem:[%s188_s28 + $0x30] sm:$0xff] %v325_v42 }
  0xea   : > { %330 = vst [vmem:[%s188_s28 + $0x18] sm:$0xff] %v322_v43 }
  0xeb   : > { %334 = vst [vmem:[%s188_s28 + $0x38] sm:$0xff] %v326_v44 }
  0xec   : > { %531 = shalt.err (!%p528_p5)
}
  0xed   : > { %s532_s11 = scalar_lea.hbm %s705_s6, 1024  ;;  %s536_s21 = scalar_lea.hbm %s759_s3, 2048 }
  0xee   : > { %p533_p6 = scmp.ne.s32.totalorder %s705_s6, %s532_s11  ;;  %p537_p10 = scmp.lt.s32.totalorder %s705_s6, %s759_s3 }
  0xef   : > { %p538_p11 = scmp.lt.s32.totalorder %s536_s21, %s532_s11 }
  0xf0   : > { %p534_p7 = pnand %p533_p6, %p660_p4 }
  0xf1   : > { %p539_p12 = por %p538_p11, %p537_p10 }
  0xf2   : > { %p535_p9 = pneg %p534_p7 }
  0xf4   : > { %p540_p13 = pnand %p539_p12, %p535_p9 }
  0xf6   : > { %543 = shalt.err (!%p540_p13)
}
  0xf7   : > { %s598_s27 = smov 256   ;;  %s599_s28 = smov 16  }
  0xf8   : > { %453 = dma.vmem_to_hbm [thread:$0]  (%p660_p4), %s707_s30, 1024, %s705_s6, %s711_s15, %s598_s27, %s598_s27, %s599_s28  }
  0xf9 PF: > { %p459_p0 = scmp.ge.s32.totalorder %s594_s17, 2  ;;  %s366_s29 = sand.u32 1, %s574_s12  }
  0xfa   : > { %s367_s4 = scalar_lea.sflag [#allocation3], %s366_s29 }
  0xfb   : > { %p456_p1 = pnand %p459_p0, %p667_p8 }
  0xfd   : > { %p457_p2 = pneg %p456_p1 }
  0xff   : > { %569 = dma.done.wait (%p457_p2), %s367_s4, 1024  }
 0x100   : > { %571 = vsyncadd (%p457_p2), %s367_s4, 4294966272  ;;  %s16_s17 = sadd.s32 1, %s594_s17   ;;  %s762_s12 = smov %s578_s13 }
 0x101   : > { %p13_p3 = scmp.ge.s32.totalorder %s16_s17, 4   ;;  %s763_s13 = smov %s582_s14 }
 0x102   : > { %s764_s14 = smov %s673_s25  ;;  %s765_s15 = smov %s590_s16 }
 0x103   : > { %s766_s16 = smov %s768_s20  ;;  %15 = sbr.rel (!%p13_p3) target bundleno = 4 (0x4), region = 67 }
 0x108   :  { %372 = vsyncpa [#allocation3], 1 }
 0x109   :  { %374 = vsyncpa [#allocation3 + $0x1], 1 }

</bundles_post_ra>
